<compile_context>
chip_gen: v6e
topology: v6e:2x2x1
jax: 0.10.0
libtpu: 0.0.40
codegen_flags: <defaults>
</compile_context>

<pallas_src>
import functools

import jax
import jax.numpy as jnp
from jax.experimental import pallas as pl
from jax.experimental.pallas import tpu as pltpu

HIDDEN = 64
BN_EPS = 1e-5
_VMEM_LIMIT = 32 * 1024 * 1024  # safe on v5e/v6e (128 MiB) and v7x (64 MiB physical)


def _round_up(n, m):
    return ((n + m - 1) // m) * m


def _choose_tile_b(batch, d_in):
    # Keep double-buffered x tiles + hidden activations + headroom well under the
    # scoped VMEM limit on every generation (v7x is the tightest).
    rows_budget = (8 * 1024 * 1024) // (4 * max(d_in, HIDDEN))
    tile = min(512, max(8, rows_budget), _round_up(batch, 8))
    return max(8, (tile // 8) * 8)


# ---------------------------------------------------------------------------
# Pass 1: accumulate per-feature sum and sum-of-squares of h = relu(x@w1 + b1)
# ---------------------------------------------------------------------------
def _stats_kernel(x_ref, w1_ref, b1_ref, sum_ref, sumsq_ref, *, batch, tile_b):
    i = pl.program_id(0)

    @pl.when(i == 0)
    def _():
        sum_ref[...] = jnp.zeros_like(sum_ref)
        sumsq_ref[...] = jnp.zeros_like(sumsq_ref)

    h = jnp.maximum(
        jnp.dot(x_ref[...], w1_ref[...], preferred_element_type=jnp.float32)
        + b1_ref[...],
        0.0,
    )

    # Mask rows past the true batch size (zero-padded tail tile).
    row = i * tile_b + jax.lax.broadcasted_iota(jnp.int32, (tile_b, 1), 0)
    h = jnp.where(row < batch, h, 0.0)

    sum_ref[...] += jnp.sum(h, axis=0, keepdims=True)
    sumsq_ref[...] += jnp.sum(h * h, axis=0, keepdims=True)


# ---------------------------------------------------------------------------
# Pass 2: out = relu(x@w1 + b1) @ w2' + b2'   (BN folded into w2'/b2')
# ---------------------------------------------------------------------------
def _fwd_kernel(x_ref, w1_ref, b1_ref, w2_ref, b2_ref, o_ref):
    h = jnp.maximum(
        jnp.dot(x_ref[...], w1_ref[...], preferred_element_type=jnp.float32)
        + b1_ref[...],
        0.0,
    )
    o_ref[...] = (
        jnp.dot(h, w2_ref[...], preferred_element_type=jnp.float32) + b2_ref[...]
    ).astype(o_ref.dtype)


def encoder_forward(x, w1, b1, gamma, beta, w2, b2, *, tile_b=None):
    """x: [B, D_in] float32. Returns [B, D_out] float32 (training-mode BN)."""
    B, d_in = x.shape
    d_out = w2.shape[1]
    x = x.astype(jnp.float32)

    if tile_b is None:
        tile_b = _choose_tile_b(B, d_in)
    b_pad = _round_up(B, tile_b)
    x_p = x if b_pad == B else jnp.pad(x, ((0, b_pad - B), (0, 0)))
    num_tiles = b_pad // tile_b

    x_spec = pl.BlockSpec((tile_b, d_in), lambda i: (i, 0))
    rep = lambda shape: pl.BlockSpec(shape, lambda i: (0, 0))  # grid-invariant (resident)

    # ---- Pass 1: global batch statistics ----
    s_sum, s_sumsq = pl.pallas_call(
        functools.partial(_stats_kernel, batch=B, tile_b=tile_b),
        out_shape=(
            jax.ShapeDtypeStruct((1, HIDDEN), jnp.float32),
            jax.ShapeDtypeStruct((1, HIDDEN), jnp.float32),
        ),
        grid=(num_tiles,),
        in_specs=[x_spec, rep((d_in, HIDDEN)), rep((1, HIDDEN))],
        out_specs=(rep((1, HIDDEN)), rep((1, HIDDEN))),
        compiler_params=pltpu.CompilerParams(
            dimension_semantics=("arbitrary",), vmem_limit_bytes=_VMEM_LIMIT
        ),
    )(x_p, w1, b1)

    # ---- Tiny [1,64] glue: fold BN (scale/shift) into Linear2 ----
    inv_b = 1.0 / B
    mean = s_sum * inv_b
    var = jnp.maximum(s_sumsq * inv_b - mean * mean, 0.0)  # biased (training-mode) var
    s = gamma * jax.lax.rsqrt(var + BN_EPS)                 # [1, 64]
    t = beta - mean * s                                     # [1, 64]
    w2_f = w2 * s.reshape(HIDDEN, 1)                        # [64, D_out]
    b2_f = b2 + t @ w2                                      # [1, D_out]

    # ---- Pass 2: normalized output, batch tiles fully parallel ----
    out = pl.pallas_call(
        _fwd_kernel,
        out_shape=jax.ShapeDtypeStruct((b_pad, d_out), jnp.float32),
        grid=(num_tiles,),
        in_specs=[
            x_spec,
            rep((d_in, HIDDEN)),
            rep((1, HIDDEN)),
            rep((HIDDEN, d_out)),
            rep((1, d_out)),
        ],
        out_specs=pl.BlockSpec((tile_b, d_out), lambda i: (i, 0)),
        compiler_params=pltpu.CompilerParams(
            dimension_semantics=("parallel",), vmem_limit_bytes=_VMEM_LIMIT
        ),
    )(x_p, w1, b1, w2_f, b2_f)

    return out[:B]


def init_params(key, input_dim, out_dim):
    """PyTorch-style init: Linear uniform(-1/sqrt(fan_in), ...), BN gamma=1, beta=0."""
    k1, k2, k3, k4 = jax.random.split(key, 4)

    bound1 = 1.0 / jnp.sqrt(input_dim)
    w1 = jax.random.uniform(k1, (input_dim, HIDDEN), jnp.float32, -bound1, bound1)
    b1 = jax.random.uniform(k2, (1, HIDDEN), jnp.float32, -bound1, bound1)

    bound2 = 1.0 / jnp.sqrt(HIDDEN)
    w2 = jax.random.uniform(k3, (HIDDEN, out_dim), jnp.float32, -bound2, bound2)
    b2 = jax.random.uniform(k4, (1, out_dim), jnp.float32, -bound2, bound2)

    gamma = jnp.ones((1, HIDDEN), jnp.float32)
    beta = jnp.zeros((1, HIDDEN), jnp.float32)
    return w1, b1, gamma, beta, w2, b2


def reference_forward(x, w1, b1, gamma, beta, w2, b2):
    """Plain-JAX reference mirroring the PyTorch module (training-mode BN)."""
    h = jnp.maximum(x @ w1 + b1, 0.0)
    mean = jnp.mean(h, axis=0, keepdims=True)
    var = jnp.mean((h - mean) ** 2, axis=0, keepdims=True)
    hn = (h - mean) / jnp.sqrt(var + BN_EPS) * gamma + beta
    return hn @ w2 + b2


if __name__ == "__main__":
    key = jax.random.PRNGKey(0)
    k_x, k_p, k_x2 = jax.random.split(key, 3)

    # Small shapes consistent with the module: Linear(32,64) -> ReLU -> BN(64) -> Linear(64,16)
    B, input_dim, out_dim = 8, 32, 16
    x = jax.random.normal(k_x, (B, input_dim), jnp.float32)
    params = init_params(k_p, input_dim, out_dim)

    out = encoder_forward(x, *params)
    jax.block_until_ready(out)
    ref = reference_forward(x, *params)
    assert out.shape == (B, out_dim)
    assert jnp.allclose(out, ref, atol=2e-4, rtol=2e-4), float(jnp.max(jnp.abs(out - ref)))

    # Exercise the multi-tile + ragged-batch path (4 grid steps, masked last tile).
    B2, d_in2, d_out2 = 200, 96, 24
    x2 = jax.random.normal(k_x2, (B2, d_in2), jnp.float32)
    params2 = init_params(k_p, d_in2, d_out2)
    out2 = encoder_forward(x2, *params2, tile_b=64)
    jax.block_until_ready(out2)
    ref2 = reference_forward(x2, *params2)
    assert out2.shape == (B2, d_out2)
    assert jnp.allclose(out2, ref2, atol=2e-4, rtol=2e-4), float(jnp.max(jnp.abs(out2 - ref2)))

    print("KERNEL_OK")
</pallas_src>

<mosaic_0001>
module attributes {stable_mosaic.version = 11 : i64} {
  func.func @_stats_kernel(%arg0: i32, %arg1: memref<8x32xf32, #tpu.memory_space<vmem>>, %arg2: memref<32x64xf32, #tpu.memory_space<vmem>>, %arg3: memref<1x64xf32, #tpu.memory_space<vmem>>, %arg4: memref<1x64xf32, #tpu.memory_space<vmem>>, %arg5: memref<1x64xf32, #tpu.memory_space<vmem>>) attributes {dimension_semantics = [#tpu.dimension_semantics<arbitrary>], iteration_bounds = array<i64: 1>, scalar_prefetch = 0 : i64, scratch_operands = 0 : i64, tpu.core_type = #tpu.core_type<tc>, window_params = [{transform_indices = @transform_0, window_bounds = array<i64: 8, 32>}, {pipeline_mode = #tpu.pipeline_mode<synchronous>, transform_indices = @transform_1, window_bounds = array<i64: 32, 64>}, {pipeline_mode = #tpu.pipeline_mode<synchronous>, transform_indices = @transform_2, window_bounds = array<i64: 1, 64>}, {pipeline_mode = #tpu.pipeline_mode<synchronous>, transform_indices = @transform_3, window_bounds = array<i64: 1, 64>}, {pipeline_mode = #tpu.pipeline_mode<synchronous>, transform_indices = @transform_4, window_bounds = array<i64: 1, 64>}]} {
    %c0_i32 = arith.constant 0 : i32
    %0 = arith.cmpi eq, %arg0, %c0_i32 : i32
    %1 = arith.extui %0 : i1 to i32
    %c0_i32_0 = arith.constant 0 : i32
    %2 = arith.cmpi ne, %1, %c0_i32_0 : i32
    scf.if %2 {
      %cst_19 = arith.constant 0.000000e+00 : f32
      %32 = vector.broadcast %cst_19 : f32 to vector<1x64xf32>
      %c0_20 = arith.constant 0 : index
      %c0_21 = arith.constant 0 : index
      %33 = vector.load %arg4[%c0_20, %c0_21] : memref<1x64xf32, #tpu.memory_space<vmem>>, vector<1x64xf32>
      tpu.vector_store %arg4[%c0_20, %c0_21], %32 {strides = array<i32>} : memref<1x64xf32, #tpu.memory_space<vmem>>, vector<1x64xf32>,
      %cst_22 = arith.constant 0.000000e+00 : f32
      %34 = vector.broadcast %cst_22 : f32 to vector<1x64xf32>
      %c0_23 = arith.constant 0 : index
      %c0_24 = arith.constant 0 : index
      %35 = vector.load %arg5[%c0_23, %c0_24] : memref<1x64xf32, #tpu.memory_space<vmem>>, vector<1x64xf32>
      tpu.vector_store %arg5[%c0_23, %c0_24], %34 {strides = array<i32>} : memref<1x64xf32, #tpu.memory_space<vmem>>, vector<1x64xf32>,
    } else {
    }
    %c0 = arith.constant 0 : index
    %c0_1 = arith.constant 0 : index
    %3 = vector.load %arg1[%c0, %c0_1] : memref<8x32xf32, #tpu.memory_space<vmem>>, vector<8x32xf32>
    %c0_2 = arith.constant 0 : index
    %c0_3 = arith.constant 0 : index
    %4 = vector.load %arg2[%c0_2, %c0_3] : memref<32x64xf32, #tpu.memory_space<vmem>>, vector<32x64xf32>
    %cst = arith.constant dense<0.000000e+00> : vector<8x64xf32>
    %5 = tpu.matmul %3, %4, %cst {dimension_numbers = #tpu.dot_dimension_numbers<[1], [0], [0], [1], [0, 0, 1, 1], [], []>} : vector<8x32xf32>, vector<32x64xf32>, vector<8x64xf32> -> vector<8x64xf32>
    %c0_4 = arith.constant 0 : index
    %c0_5 = arith.constant 0 : index
    %6 = vector.load %arg3[%c0_4, %c0_5] : memref<1x64xf32, #tpu.memory_space<vmem>>, vector<1x64xf32>
    %7 = vector.broadcast %6 : vector<1x64xf32> to vector<8x64xf32>
    %8 = arith.addf %5, %7 : vector<8x64xf32>
    %cst_6 = arith.constant 0.000000e+00 : f32
    %9 = vector.broadcast %cst_6 : f32 to vector<8x64xf32>
    %10 = arith.maximumf %8, %9 : vector<8x64xf32>
    %c8_i32 = arith.constant 8 : i32
    %11 = arith.muli %arg0, %c8_i32 : i32
    %12 = tpu.iota {dimensions = array<i32: 0>} : vector<8x1xi32>
    %13 = vector.broadcast %11 : i32 to vector<8x1xi32>
    %14 = arith.addi %13, %12 : vector<8x1xi32>
    %c8_i32_7 = arith.constant 8 : i32
    %15 = vector.broadcast %c8_i32_7 : i32 to vector<8x1xi32>
    %16 = arith.cmpi slt, %14, %15 : vector<8x1xi32>
    %cst_8 = arith.constant 0.000000e+00 : f32
    %17 = vector.shape_cast %16 : vector<8x1xi1> to vector<8x1xi1>
    %18 = vector.broadcast %17 : vector<8x1xi1> to vector<8x64xi1>
    %19 = vector.broadcast %cst_8 : f32 to vector<8x64xf32>
    %20 = arith.select %18, %10, %19 : vector<8x64xi1>, vector<8x64xf32>
    %c0_9 = arith.constant 0 : index
    %c0_10 = arith.constant 0 : index
    %21 = vector.load %arg4[%c0_9, %c0_10] : memref<1x64xf32, #tpu.memory_space<vmem>>, vector<1x64xf32>
    %cst_11 = arith.constant dense<0.000000e+00> : vector<64xf32>
    %22 = vector.multi_reduction <add>, %20, %cst_11 [0] : vector<8x64xf32> to vector<64xf32>
    %23 = vector.shape_cast %22 : vector<64xf32> to vector<1x64xf32>
    %24 = arith.addf %21, %23 : vector<1x64xf32>
    %c0_12 = arith.constant 0 : index
    %c0_13 = arith.constant 0 : index
    %25 = vector.load %arg4[%c0_12, %c0_13] : memref<1x64xf32, #tpu.memory_space<vmem>>, vector<1x64xf32>
    tpu.vector_store %arg4[%c0_12, %c0_13], %24 {strides = array<i32>} : memref<1x64xf32, #tpu.memory_space<vmem>>, vector<1x64xf32>,
    %c0_14 = arith.constant 0 : index
    %c0_15 = arith.constant 0 : index
    %26 = vector.load %arg5[%c0_14, %c0_15] : memref<1x64xf32, #tpu.memory_space<vmem>>, vector<1x64xf32>
    %27 = arith.mulf %20, %20 : vector<8x64xf32>
    %cst_16 = arith.constant dense<0.000000e+00> : vector<64xf32>
    %28 = vector.multi_reduction <add>, %27, %cst_16 [0] : vector<8x64xf32> to vector<64xf32>
    %29 = vector.shape_cast %28 : vector<64xf32> to vector<1x64xf32>
    %30 = arith.addf %26, %29 : vector<1x64xf32>
    %c0_17 = arith.constant 0 : index
    %c0_18 = arith.constant 0 : index
    %31 = vector.load %arg5[%c0_17, %c0_18] : memref<1x64xf32, #tpu.memory_space<vmem>>, vector<1x64xf32>
    tpu.vector_store %arg5[%c0_17, %c0_18], %30 {strides = array<i32>} : memref<1x64xf32, #tpu.memory_space<vmem>>, vector<1x64xf32>,
    return
  }
  func.func @transform_0(%arg0: i32) -> (i32, i32) {
    %c0_i32 = arith.constant 0 : i32
    %c0_i32_0 = arith.constant 0 : i32
    return %arg0, %c0_i32 : i32, i32
  }
  func.func @transform_1(%arg0: i32) -> (i32, i32) {
    %c0_i32 = arith.constant 0 : i32
    %c0_i32_0 = arith.constant 0 : i32
    %c0_i32_1 = arith.constant 0 : i32
    return %c0_i32, %c0_i32_0 : i32, i32
  }
  func.func @transform_2(%arg0: i32) -> (i32, i32) {
    %c0_i32 = arith.constant 0 : i32
    %c0_i32_0 = arith.constant 0 : i32
    %c0_i32_1 = arith.constant 0 : i32
    return %c0_i32, %c0_i32_0 : i32, i32
  }
  func.func @transform_3(%arg0: i32) -> (i32, i32) {
    %c0_i32 = arith.constant 0 : i32
    %c0_i32_0 = arith.constant 0 : i32
    %c0_i32_1 = arith.constant 0 : i32
    return %c0_i32, %c0_i32_0 : i32, i32
  }
  func.func @transform_4(%arg0: i32) -> (i32, i32) {
    %c0_i32 = arith.constant 0 : i32
    %c0_i32_0 = arith.constant 0 : i32
    %c0_i32_1 = arith.constant 0 : i32
    return %c0_i32, %c0_i32_0 : i32, i32
  }
}

</mosaic_0001>

<bundles_post_ra>
// kernel: tpu_custom_call.1
= control target key start
LH: loop header
LB: loop body
LE: loop exit
PB: predicated region body
PF: predicated region fallthrough
CT: control target
= control target key end

     0   :  { %10 = vsyncpa [#allocation3], 0  ;;  %s366_s0 = inlined_call_operand.hbm [shape: f32[8,32], index: 0, kind: input, shape index: {}]   ;;  %s367_s1 = inlined_call_operand.hbm [shape: f32[32,64], index: 1, kind: input, shape index: {}]   ;;  %s368_s2 = inlined_call_operand.vmem [shape: f32[1,64], index: 2, kind: input, shape index: {}]   ;;  %s369_s3 = inlined_call_operand.hbm [shape: f32[1,64], index: 3, kind: output, shape index: {0}]   ;;  %s370_s4 = inlined_call_operand.hbm [shape: f32[1,64], index: 4, kind: output, shape index: {1}]  }
   0x1   :  { %11 = vsyncpa [#allocation6], 0 }
   0x2   :  { %12 = vsyncpa [#allocation4], 0 }
   0x3   :  { %13 = vsyncpa [#allocation9], 0  ;;  %s314_s15 = smov [#allocation2]   ;;  %s315_s17 = smov [#allocation5]  }
   0x4   :  { %s20_s16 = sshll.u32 %s314_s15, 4  ;;  %s29_s18 = sshll.u32 %s315_s17, 4  ;;  %s21_s16 = int_to_ptr.vmem [resolvable:$true] %s20_s16  ;;  %s30_s18 = int_to_ptr.vmem [resolvable:$true] %s29_s18 }
   0x5   :  { %s234_s19 = scalar_lea.vmem %s21_s16, 128  ;;  %p239_p1 = scmp.lt.s32.totalorder %s21_s16, %s21_s16 }
   0x6   :  { %p235_p0 = scmp.ne.s32.totalorder %s21_s16, %s234_s19  ;;  %p240_p2 = scmp.lt.s32.totalorder %s234_s19, %s234_s19 }
   0x8   :  { %p241_p3 = por %p240_p2, %p239_p1 }
   0xa   :  { %p242_p4 = pnand %p241_p3, %p235_p0 }
   0xc   :  { %245 = shalt.err (!%p242_p4)
}
   0xd   :  { %23 = dma.hbm_to_vmem [thread:$0]  %s366_s0, 128, %s21_s16, [#allocation3]  }
   0xe   :  { %s254_s22 = scalar_lea.vmem %s30_s18, 512  ;;  %p259_p6 = scmp.lt.s32.totalorder %s30_s18, %s30_s18 }
   0xf   :  { %p255_p5 = scmp.ne.s32.totalorder %s30_s18, %s254_s22  ;;  %p260_p7 = scmp.lt.s32.totalorder %s254_s22, %s254_s22 }
  0x11   :  { %p261_p8 = por %p260_p7, %p259_p6 }
  0x13   :  { %p262_p9 = pnand %p261_p8, %p255_p5 }
  0x15   :  { %265 = shalt.err (!%p262_p9)
}
  0x16   :  { %s316_s23 = smov 128   ;;  %s317_s24 = smov 8  }
  0x17   :  { %35 = dma.hbm_to_vmem [thread:$0]  %s367_s1, 512, %s30_s18, [#allocation6], %s316_s23, %s316_s23, %s317_s24  }
  0x18   :  { %306 = dma.done.wait [#allocation3], 128  }
  0x19   :  { %307 = vsyncadd [#allocation3], 4294967168 }
  0x1a   :  { %308 = dma.done.wait [#allocation6], 512  }
  0x1b   :  { %309 = vsyncadd [#allocation6], 4294966784  ;;  %v318_v0 = vmov 0.0   ;;  %vm319_vm0 = vmmov 0   ;;  %v55_v1 = vld [vmem:[#allocation5 + $0x18] sm:$0xff]  ;;  %v54_v2 = vld [vmem:[#allocation5 + $0x10] sm:$0xff] }
  0x1c   :  { %207 = vmatprep.subr.mxu0 %v318_v0  ;;  %215 = vmatprep.mubr.msk.f32.mxu0 %vm319_vm0, %v318_v0  ;;  %v53_v3 = vld [vmem:[#allocation5 + $0x8] sm:$0xff]  ;;  %v52_v4 = vld [vmem:[#allocation5] sm:$0xff]  ;;  %v51_v5 = vld [vmem:[#allocation2] sm:$0xff]  ;;  %vm63_vm1 = vcmask 261120   ;;  %vm48_vm2 = vcmask 516096   ;;  %vm148_vm3 = vcmask 523264  }
  0x1d   :  { %208 = vmatpush3.msra.mxu0 %v55_v1  ;;  %49 = vst.msk [vmem:[#allocation7] sm:$0x1] %vm48_vm2, %v318_v0  ;;  %50 = vst.msk [vmem:[#allocation8] sm:$0x1] %vm48_vm2, %v318_v0  ;;  %v200_v6 = vld [vmem:[%s368_s2] ss:$0 sm:$0xff] }
  0x1e   :  { %209 = vmatprep.subr.mxu0 %v318_v0  ;;  %s320_s27 = smov [#allocation7]   ;;  %s321_s28 = smov [#allocation8]  }
  0x1f   :  { %210 = vmatpush3.msra.mxu0 %v54_v2  ;;  %s176_s2 = sshll.u32 %s320_s27, 4  ;;  %s186_s29 = sshll.u32 %s321_s28, 4  ;;  %s177_s2 = int_to_ptr.vmem [resolvable:$true] %s176_s2  ;;  %s187_s29 = int_to_ptr.vmem [resolvable:$true] %s186_s29 }
  0x20   :  { %211 = vmatprep.subr.mxu0 %v318_v0  ;;  %s266_s30 = scalar_lea.vmem %s177_s2, 16  ;;  %s270_s5 = scalar_lea.vmem %s177_s2, 32 }
  0x21   :  { %212 = vmatpush3.msra.mxu0 %v53_v3  ;;  %p267_p10 = scmp.ne.s32.totalorder %s177_s2, %s266_s30  ;;  %p271_p11 = scmp.lt.s32.totalorder %s177_s2, %s177_s2 }
  0x22   :  { %213 = vmatprep.subr.mxu0 %v318_v0  ;;  %p272_p12 = scmp.lt.s32.totalorder %s270_s5, %s266_s30 }
  0x23   :  { %214 = vmatpush3.msra.mxu0 %v52_v4 }
  0x24   :  { %216 = vmatmul.mubr.msk.f32.vlgmr.msra.gmra.mxu0 %vm63_vm1, %v51_v5  ;;  %v147_v23 = vld [vmem:[#allocation7] sm:$0x1]  ;;  %v159_v26 = vld [vmem:[#allocation8] sm:$0x1]  ;;  %p273_p13 = por %p272_p12, %p271_p11 }
  0x26   :  { %p274_p0 = pnand %p273_p13, %p267_p10 }
  0xe4   :  { %v133_v7 = vpop.f32.mrf.mxu0 }
  0xe5   :  { %v134_v8 = vadd.f32 %v200_v6, %v133_v7 }
  0xe6   :  { %v217_v9 = vpop.f32.mrf.mxu0 }
  0xe7   :  { %v137_v10 = vmax.f32 %v134_v8, 0.0 }
  0xe9   :  { %v149_v11 = vsel %vm148_vm3, %v137_v10, 0.0  ;;  %v160_v12 = vmul.f32 %v137_v10, %v137_v10 }
  0xea   :  { %v150_v13 = vrot.slane %v149_v11, 4 }
  0xeb   :  { %v161_v14 = vsel %vm148_vm3, %v160_v12, 0.0 }
  0xec   :  { %v151_v15 = vadd.f32 %v150_v13, %v149_v11  ;;  %v162_v16 = vrot.slane %v161_v14, 4 }
  0xee   :  { %v152_v17 = vrot.slane %v151_v15, 2  ;;  %v163_v18 = vadd.f32 %v162_v16, %v161_v14 }
  0xf0   :  { %v153_v19 = vadd.f32 %v152_v17, %v151_v15  ;;  %v164_v20 = vrot.slane %v163_v18, 2 }
  0xf2   :  { %v154_v21 = vrot.slane %v153_v19, 1  ;;  %v165_v22 = vadd.f32 %v164_v20, %v163_v18 }
  0xf4   :  { %v155_v24 = vadd.f32 %v154_v21, %v153_v19  ;;  %v166_v25 = vrot.slane %v165_v22, 1 }
  0xf6   :  { %v167_v27 = vadd.f32 %v166_v25, %v165_v22  ;;  %v156_v28 = vadd.f32 %v155_v24, %v147_v23 }
  0xf8   :  { %158 = vst.msk [vmem:[#allocation7] sm:$0x1] %vm48_vm2, %v156_v28  ;;  %v168_v29 = vadd.f32 %v167_v27, %v159_v26 }
  0xf9   :  { %277 = shalt.err (!%p274_p0)
}
  0xfa   :  { %179 = dma.vmem_to_hbm [thread:$0]  %s177_s2, 16, %s369_s3, [#allocation4]   ;;  %169 = vst.msk [vmem:[#allocation8] sm:$0x1] %vm48_vm2, %v168_v29 }
  0xfb   :  { %s286_s8 = scalar_lea.vmem %s187_s29, 16  ;;  %s290_s9 = scalar_lea.vmem %s187_s29, 32 }
  0xfc   :  { %p287_p1 = scmp.ne.s32.totalorder %s187_s29, %s286_s8  ;;  %p291_p2 = scmp.lt.s32.totalorder %s187_s29, %s187_s29 }
  0xfd   :  { %p292_p3 = scmp.lt.s32.totalorder %s290_s9, %s286_s8 }
  0xff   :  { %p293_p4 = por %p292_p3, %p291_p2 }
 0x101   :  { %p294_p5 = pnand %p293_p4, %p287_p1 }
 0x103   :  { %297 = shalt.err (!%p294_p5)
}
 0x104   :  { %189 = dma.vmem_to_hbm [thread:$0]  %s187_s29, 16, %s370_s4, [#allocation9]  }
 0x105   :  { %310 = dma.done.wait [#allocation4], 16  }
 0x106   :  { %311 = vsyncadd [#allocation4], 4294967280 }
 0x107   :  { %312 = dma.done.wait [#allocation9], 16  }
 0x108   :  { %313 = vsyncadd [#allocation9], 4294967280 }
 0x109   :  { %196 = vsyncpa [#allocation3], 1 }
 0x10a   :  { %197 = vsyncpa [#allocation6], 1 }
 0x10b   :  { %198 = vsyncpa [#allocation4], 1 }
 0x10c   :  { %199 = vsyncpa [#allocation9], 1 }

</bundles_post_ra>
